<compile_context>
chip_gen: v6e
topology: v6e:2x2x1
jax: 0.10.0
libtpu: 0.0.40
codegen_flags: <defaults>
</compile_context>

<pallas_src>
import math

import jax
import jax.numpy as jnp
from jax.experimental import pallas as pl
from jax.experimental.pallas import tpu as pltpu


def _round_up(x: int, m: int) -> int:
    return ((x + m - 1) // m) * m


def _round_down(x: int, m: int) -> int:
    return (x // m) * m


def _mhd_kernel(x_ref, w_ref, o_ref):
    # x_ref: (TILE_M, d) tile of the flattened (b*wh, d) input (model dtype)
    # w_ref: (d, d)      shared weight (compute dtype), resident across steps
    # o_ref: (TILE_M, d) output tile (model dtype)
    w = w_ref[...]
    x = x_ref[...].astype(w.dtype)  # in-VMEM cast -> bf16 MXU fast path
    o_ref[...] = jnp.dot(x, w, preferred_element_type=jnp.float32).astype(o_ref.dtype)


def multi_head_dense(
    x: jax.Array,
    weight: jax.Array,
    *,
    tile_m: int = 2048,
    compute_dtype=jnp.bfloat16,
    vmem_budget_bytes: int = 28 * 1024 * 1024,
) -> jax.Array:
    """x: (b, wh, d), weight: (d, d) -> (b, wh, d). Matches torch.bmm(x, W.repeat(b,1,1))."""
    b, wh, d = x.shape
    assert weight.shape == (d, d)
    out_dtype = x.dtype
    m = b * wh

    # Tiny-problem bypass: lane padding waste / launch overhead dominate there.
    if d < 128 or m < 8:
        out = jnp.einsum(
            "bwd,de->bwe",
            x.astype(compute_dtype),
            weight.astype(compute_dtype),
            preferred_element_type=jnp.float32,
        )
        return out.astype(out_dtype)

    x2 = x.reshape(m, d)
    w = weight.astype(compute_dtype)  # tiny one-time cast; resident copy is half-size

    itemsize_x = jnp.dtype(x.dtype).itemsize
    itemsize_o = jnp.dtype(out_dtype).itemsize
    itemsize_c = jnp.dtype(compute_dtype).itemsize

    # Sublane alignment of the M tile: 8 rows for 4-byte dtypes, 16 for 2-byte.
    align = max(32 // itemsize_x, 32 // itemsize_o, 8)

    # VMEM budget: 2 double-buffered (x tile + out tile) + 2 weight buffers,
    # using the lane-padded (multiple-of-128) footprint for the layout.
    dp = _round_up(d, 128)
    w_vmem = _round_up(d, 32 // itemsize_c) * dp * itemsize_c
    per_row_bytes = dp * (itemsize_x + itemsize_o)
    tm_cap = (vmem_budget_bytes - 2 * w_vmem) // (2 * per_row_bytes)
    tm_cap = max(align, _round_down(tm_cap, align))

    tm = min(_round_up(tile_m, align), _round_up(m, align), tm_cap)
    grid = (pl.cdiv(m, tm),)  # ragged last block: Pallas masks OOB output rows

    cost = pl.CostEstimate(
        flops=2 * m * d * d,
        transcendentals=0,
        bytes_accessed=m * d * itemsize_x + d * d * itemsize_c + m * d * itemsize_o,
    )

    out = pl.pallas_call(
        _mhd_kernel,
        out_shape=jax.ShapeDtypeStruct((m, d), out_dtype),
        grid_spec=pltpu.PrefetchScalarGridSpec(
            num_scalar_prefetch=0,
            grid=grid,
            in_specs=[
                # One M-tile of the flattened input per grid step (full d in lanes).
                pl.BlockSpec((tm, d), lambda i: (i, 0)),
                # Shared weight: same block every step -> stays resident in VMEM.
                pl.BlockSpec((d, d), lambda i: (0, 0)),
            ],
            out_specs=pl.BlockSpec((tm, d), lambda i: (i, 0)),
        ),
        compiler_params=pltpu.CompilerParams(
            # Single M-tile axis; 'parallel' lets v7x shard tiles across its
            # two TensorCores (neutral on single-TC v5e/v6e).
            dimension_semantics=("parallel",),
        ),
        cost_estimate=cost,
    )(x2, w)

    return out.reshape(b, wh, d)


def init_weight(key, d: int, dtype=jnp.float32) -> jax.Array:
    # Mirrors nn.init.kaiming_uniform_(weight, a=sqrt(5)) on a (d, d) tensor:
    # bound = gain * sqrt(3 / fan_in) = 1 / sqrt(d).
    bound = 1.0 / math.sqrt(d)
    return jax.random.uniform(key, (d, d), dtype=dtype, minval=-bound, maxval=bound)


if __name__ == "__main__":
    key = jax.random.PRNGKey(0)
    k1, k2, k3, k4 = jax.random.split(key, 4)

    def ref(xv, wv):
        # Reference with the same bf16-input / f32-accumulate contract as the kernel.
        return jnp.einsum(
            "bwd,de->bwe",
            xv.astype(jnp.bfloat16),
            wv.astype(jnp.bfloat16),
            preferred_element_type=jnp.float32,
        ).astype(xv.dtype)

    # 1) Main Pallas path: lane-aligned d, single aligned tile.
    b, wh, d = 2, 64, 128
    x = jax.random.normal(k1, (b, wh, d), dtype=jnp.float32)
    w = init_weight(k2, d)
    out = jax.block_until_ready(multi_head_dense(x, w))
    assert out.shape == (b, wh, d)
    assert jnp.allclose(out, ref(x, w), atol=1e-2, rtol=1e-2)

    # 2) Ragged cdiv grid: m = 300 rows with a forced 128-row tile (3 steps,
    #    last block partially masked on writeback).
    b2, wh2, d2 = 3, 100, 128
    x2 = jax.random.normal(k3, (b2, wh2, d2), dtype=jnp.float32)
    w2 = init_weight(k4, d2)
    out2 = jax.block_until_ready(multi_head_dense(x2, w2, tile_m=128))
    assert out2.shape == (b2, wh2, d2)
    assert jnp.allclose(out2, ref(x2, w2), atol=1e-2, rtol=1e-2)

    # 3) Tiny-d bypass path (d < 128 -> plain einsum).
    b3, wh3, d3 = 2, 16, 32
    x3 = jax.random.normal(k1, (b3, wh3, d3), dtype=jnp.float32)
    w3 = init_weight(k2, d3)
    out3 = jax.block_until_ready(multi_head_dense(x3, w3))
    assert out3.shape == (b3, wh3, d3)
    assert jnp.allclose(out3, ref(x3, w3), atol=1e-2, rtol=1e-2)

    print("KERNEL_OK")
</pallas_src>

<mosaic_0001>
module attributes {stable_mosaic.version = 11 : i64} {
  func.func @_mhd_kernel(%arg0: i32, %arg1: memref<128x128xf32, #tpu.memory_space<vmem>>, %arg2: memref<128x128xbf16, #tpu.memory_space<vmem>>, %arg3: memref<128x128xf32, #tpu.memory_space<vmem>>) attributes {dimension_semantics = [#tpu.dimension_semantics<parallel>], iteration_bounds = array<i64: 1>, scalar_prefetch = 0 : i64, scratch_operands = 0 : i64, tpu.core_type = #tpu.core_type<tc>, window_params = [{transform_indices = @transform_0, window_bounds = array<i64: 128, 128>}, {pipeline_mode = #tpu.pipeline_mode<synchronous>, transform_indices = @transform_1, window_bounds = array<i64: 128, 128>}, {transform_indices = @transform_2, window_bounds = array<i64: 128, 128>}]} {
    %c0 = arith.constant 0 : index
    %c0_0 = arith.constant 0 : index
    %0 = vector.load %arg2[%c0, %c0_0] : memref<128x128xbf16, #tpu.memory_space<vmem>>, vector<128x128xbf16>
    %c0_1 = arith.constant 0 : index
    %c0_2 = arith.constant 0 : index
    %1 = vector.load %arg1[%c0_1, %c0_2] : memref<128x128xf32, #tpu.memory_space<vmem>>, vector<128x128xf32>
    %2 = arith.truncf %1 : vector<128x128xf32> to vector<128x128xbf16>
    %cst = arith.constant dense<0.000000e+00> : vector<128x128xf32>
    %3 = tpu.matmul %2, %0, %cst {dimension_numbers = #tpu.dot_dimension_numbers<[1], [0], [0], [1], [0, 0, 1, 1], [], []>} : vector<128x128xbf16>, vector<128x128xbf16>, vector<128x128xf32> -> vector<128x128xf32>
    %c0_3 = arith.constant 0 : index
    %c0_4 = arith.constant 0 : index
    %4 = vector.load %arg3[%c0_3, %c0_4] : memref<128x128xf32, #tpu.memory_space<vmem>>, vector<128x128xf32>
    tpu.vector_store %arg3[%c0_3, %c0_4], %3 {strides = array<i32>} : memref<128x128xf32, #tpu.memory_space<vmem>>, vector<128x128xf32>,
    return
  }
  func.func @transform_0(%arg0: i32) -> (i32, i32) {
    %c0_i32 = arith.constant 0 : i32
    %c0_i32_0 = arith.constant 0 : i32
    return %arg0, %c0_i32 : i32, i32
  }
  func.func @transform_1(%arg0: i32) -> (i32, i32) {
    %c0_i32 = arith.constant 0 : i32
    %c0_i32_0 = arith.constant 0 : i32
    %c0_i32_1 = arith.constant 0 : i32
    return %c0_i32, %c0_i32_0 : i32, i32
  }
  func.func @transform_2(%arg0: i32) -> (i32, i32) {
    %c0_i32 = arith.constant 0 : i32
    %c0_i32_0 = arith.constant 0 : i32
    return %arg0, %c0_i32 : i32, i32
  }
}

</mosaic_0001>

<bundles_post_ra>
// kernel: tpu_custom_call.1
= control target key start
LH: loop header
LB: loop body
LE: loop exit
PB: predicated region body
PF: predicated region fallthrough
CT: control target
= control target key end

     0   :  { %7 = vsyncpa [#allocation3], 0  ;;  %s450_s0 = inlined_call_operand.hbm [shape: f32[128,128], index: 0, kind: input, shape index: {}]   ;;  %s451_s1 = inlined_call_operand.hbm [shape: bf16[128,128], index: 1, kind: input, shape index: {}]   ;;  %s452_s2 = inlined_call_operand.hbm [shape: f32[128,128], index: 2, kind: output, shape index: {}]  }
   0x1   :  { %8 = vsyncpa [#allocation6], 0 }
   0x2   :  { %9 = vsyncpa [#allocation4], 0  ;;  %s413_s9 = smov [#allocation2]  }
   0x3   :  { %s15_s10 = sshll.u32 %s413_s9, 4  ;;  %s16_s10 = int_to_ptr.vmem [resolvable:$true] %s15_s10 }
   0x4   :  { %s355_s11 = scalar_lea.vmem %s16_s10, 2048  ;;  %p360_p1 = scmp.lt.s32.totalorder %s16_s10, %s16_s10 }
   0x5   :  { %p356_p0 = scmp.ne.s32.totalorder %s16_s10, %s355_s11  ;;  %p361_p2 = scmp.lt.s32.totalorder %s355_s11, %s355_s11 }
   0x7   :  { %p362_p3 = por %p361_p2, %p360_p1 }
   0x9   :  { %p363_p4 = pnand %p362_p3, %p356_p0 }
   0xb   :  { %366 = shalt.err (!%p363_p4)
}
   0xc   :  { %s414_s12 = smov 128   ;;  %s415_s13 = smov 8  }
   0xd   :  { %21 = dma.hbm_to_vmem [thread:$0]  %s450_s0, 2048, %s16_s10, [#allocation3], %s414_s12, %s414_s12, %s415_s13  }
   0xe   :  { %s416_s16 = smov [#allocation5]  }
   0xf   :  { %s27_s17 = sshll.u32 %s416_s16, 4  ;;  %s28_s17 = int_to_ptr.vmem [resolvable:$true] %s27_s17 }
  0x10   :  { %s375_s18 = scalar_lea.vmem %s28_s17, 1024  ;;  %p380_p6 = scmp.lt.s32.totalorder %s28_s17, %s28_s17 }
  0x11   :  { %p376_p5 = scmp.ne.s32.totalorder %s28_s17, %s375_s18  ;;  %p381_p7 = scmp.lt.s32.totalorder %s375_s18, %s375_s18 }
  0x13   :  { %p382_p8 = por %p381_p7, %p380_p6 }
  0x15   :  { %p383_p9 = pnand %p382_p8, %p376_p5 }
  0x17   :  { %386 = shalt.err (!%p383_p9)
}
  0x18   :  { %s417_s19 = smov 64   ;;  %s418_s20 = smov 4  }
  0x19   :  { %33 = dma.hbm_to_vmem [thread:$0]  %s451_s1, 1024, %s28_s17, [#allocation6], %s417_s19, %s417_s19, %s418_s20  }
  0x1a   :  { %407 = dma.done.wait [#allocation3], 2048  }
  0x1b   :  { %408 = vsyncadd [#allocation3], 4294965248 }
  0x1c   :  { %409 = dma.done.wait [#allocation6], 1024  }
  0x1d   :  { %410 = vsyncadd [#allocation6], 4294966272  ;;  %v339_v0 = vld [vmem:[#allocation5 + $0x38] sm:$0xff]   ;;  %v340_v1 = vld [vmem:[#allocation5 + $0x30] sm:$0xff]   ;;  %s419_s0 = smov [#allocation7]  }
  0x1e   :  { %284 = vmatprep.subr.bf16.mxu0 %v339_v0  ;;  %316 = vmatprep.subr.bf16.mxu1 %v339_v0  ;;  %v341_v2 = vld [vmem:[#allocation5 + $0x28] sm:$0xff]   ;;  %v342_v3 = vld [vmem:[#allocation5 + $0x20] sm:$0xff]   ;;  %v343_v10 = vld [vmem:[#allocation5 + $0x18] sm:$0xff]   ;;  %s247_s1 = sshll.u32 %s419_s0, 4  ;;  %s248_s1 = int_to_ptr.vmem [resolvable:$true] %s247_s1 }
  0x1f   :  { %285 = vmatpush3.bf16.msra.mxu0 %v339_v0  ;;  %324 = vmatpush3.bf16.msra.mxu1 %v339_v0  ;;  %v57_v4 = vld [vmem:[#allocation2] sm:$0xff]  ;;  %v58_v5 = vld [vmem:[#allocation2 + $0x8] sm:$0xff]  ;;  %v344_v11 = vld [vmem:[#allocation5 + $0x10] sm:$0xff]   ;;  %s387_s23 = scalar_lea.vmem %s248_s1, 2048  ;;  %p392_p11 = scmp.lt.s32.totalorder %s248_s1, %s248_s1 }
  0x20   :  { %286 = vmatprep.subr.bf16.mxu0 %v340_v1  ;;  %317 = vmatprep.subr.bf16.mxu1 %v340_v1  ;;  %v65_v6 = vld [vmem:[#allocation2 + $0x40] sm:$0xff]  ;;  %v73_v7 = vpack.c.bf16 %v58_v5, %v57_v4  ;;  %v66_v8 = vld [vmem:[#allocation2 + $0x48] sm:$0xff]  ;;  %v59_v14 = vld [vmem:[#allocation2 + $0x10] sm:$0xff]  ;;  %p388_p10 = scmp.ne.s32.totalorder %s248_s1, %s387_s23  ;;  %p393_p12 = scmp.lt.s32.totalorder %s387_s23, %s387_s23 }
  0x21   :  { %v77_v9 = vpack.c.bf16 %v66_v8, %v65_v6  ;;  %v345_v12 = vld [vmem:[#allocation5 + $0x8] sm:$0xff]   ;;  %v346_v13 = vld [vmem:[#allocation5] sm:$0xff]   ;;  %v60_v15 = vld [vmem:[#allocation2 + $0x18] sm:$0xff] }
  0x22   :  { %300 = vmatprep.mubr.bf16.mxu0 %v73_v7  ;;  %v67_v16 = vld [vmem:[#allocation2 + $0x50] sm:$0xff]  ;;  %v68_v17 = vld [vmem:[#allocation2 + $0x58] sm:$0xff]  ;;  %v61_v18 = vld [vmem:[#allocation2 + $0x20] sm:$0xff]  ;;  %v74_v22 = vpack.c.bf16 %v60_v15, %v59_v14  ;;  %p394_p13 = por %p393_p12, %p392_p11 }
  0x23   :  { %287 = vmatpush3.bf16.msra.mxu0 %v340_v1  ;;  %325 = vmatpush3.bf16.msra.mxu1 %v340_v1  ;;  %v62_v19 = vld [vmem:[#allocation2 + $0x28] sm:$0xff]  ;;  %v69_v20 = vld [vmem:[#allocation2 + $0x60] sm:$0xff]  ;;  %v78_v23 = vpack.c.bf16 %v68_v17, %v67_v16  ;;  %v63_v26 = vld [vmem:[#allocation2 + $0x30] sm:$0xff] }
  0x24   :  { %288 = vmatprep.subr.bf16.mxu0 %v341_v2  ;;  %318 = vmatprep.subr.bf16.mxu1 %v341_v2  ;;  %v70_v21 = vld [vmem:[#allocation2 + $0x68] sm:$0xff]  ;;  %v75_v24 = vpack.c.bf16 %v62_v19, %v61_v18  ;;  %v64_v27 = vld [vmem:[#allocation2 + $0x38] sm:$0xff]  ;;  %v71_v28 = vld [vmem:[#allocation2 + $0x70] sm:$0xff]  ;;  %p395_p0 = pnand %p394_p13, %p388_p10 }
  0x25   :  { %308 = vmatprep.mubr.bf16.mxu1 %v77_v9  ;;  %v79_v25 = vpack.c.bf16 %v70_v21, %v69_v20  ;;  %v72_v29 = vld [vmem:[#allocation2 + $0x78] sm:$0xff]  ;;  %v76_v30 = vpack.c.bf16 %v64_v27, %v63_v26 }
  0x26   :  { %v80_v31 = vpack.c.bf16 %v72_v29, %v71_v28 }
  0x27   :  { %289 = vmatpush3.bf16.msra.mxu0 %v341_v2  ;;  %326 = vmatpush3.bf16.msra.mxu1 %v341_v2 }
  0x28   :  { %290 = vmatprep.subr.bf16.mxu0 %v342_v3  ;;  %319 = vmatprep.subr.bf16.mxu1 %v342_v3 }
  0x2b   :  { %291 = vmatpush3.bf16.msra.mxu0 %v342_v3  ;;  %327 = vmatpush3.bf16.msra.mxu1 %v342_v3 }
  0x2c   :  { %292 = vmatprep.subr.bf16.mxu0 %v343_v10  ;;  %320 = vmatprep.subr.bf16.mxu1 %v343_v10 }
  0x2f   :  { %293 = vmatpush3.bf16.msra.mxu0 %v343_v10  ;;  %328 = vmatpush3.bf16.msra.mxu1 %v343_v10 }
  0x30   :  { %294 = vmatprep.subr.bf16.mxu0 %v344_v11  ;;  %321 = vmatprep.subr.bf16.mxu1 %v344_v11 }
  0x33   :  { %295 = vmatpush3.bf16.msra.mxu0 %v344_v11  ;;  %329 = vmatpush3.bf16.msra.mxu1 %v344_v11 }
  0x34   :  { %296 = vmatprep.subr.bf16.mxu0 %v345_v12  ;;  %322 = vmatprep.subr.bf16.mxu1 %v345_v12 }
  0x37   :  { %297 = vmatpush3.bf16.msra.mxu0 %v345_v12  ;;  %330 = vmatpush3.bf16.msra.mxu1 %v345_v12 }
  0x38   :  { %298 = vmatprep.subr.bf16.mxu0 %v346_v13  ;;  %323 = vmatprep.subr.bf16.mxu1 %v346_v13 }
  0x3b   :  { %299 = vmatpush3.bf16.msra.mxu0 %v346_v13  ;;  %331 = vmatpush3.bf16.msra.mxu1 %v346_v13 }
  0x3e   :  { %301 = vmatmul.mubr.bf16.vlgmr.msra.gmra.mxu0 %v74_v22  ;;  %309 = vmatmul.mubr.bf16.vlgmr.msra.gmra.mxu1 %v78_v23 }
  0x3f   :  { %304 = vmatprep.mubr.bf16.mxu0 %v75_v24  ;;  %312 = vmatprep.mubr.bf16.mxu1 %v79_v25 }
  0x46   :  { %305 = vmatmul.mubr.bf16.gmra.mxu0 %v76_v30  ;;  %313 = vmatmul.mubr.bf16.gmra.mxu1 %v80_v31 }
  0xfe   :  { %v302_v32 = vpop.f32.mrf.mxu0  ;;  %v310_v33 = vpop.f32.mrf.mxu1 }
  0xff   :  { %228 = vst [vmem:[#allocation7 + $0x10] sm:$0xff] %v302_v32  ;;  %236 = vst [vmem:[#allocation7 + $0x50] sm:$0xff] %v310_v33 }
 0x100   :  { %v163_v34 = vpop.f32.mrf.mxu0  ;;  %v195_v35 = vpop.f32.mrf.mxu1 }
 0x101   :  { %226 = vst [vmem:[#allocation7] sm:$0xff] %v163_v34  ;;  %234 = vst [vmem:[#allocation7 + $0x40] sm:$0xff] %v195_v35 }
 0x102   :  { %v303_v36 = vpop.f32.mrf.mxu0  ;;  %v311_v37 = vpop.f32.mrf.mxu1 }
 0x103   :  { %229 = vst [vmem:[#allocation7 + $0x18] sm:$0xff] %v303_v36  ;;  %237 = vst [vmem:[#allocation7 + $0x58] sm:$0xff] %v311_v37 }
 0x104   :  { %v166_v38 = vpop.f32.mrf.mxu0  ;;  %v198_v39 = vpop.f32.mrf.mxu1 }
 0x105   :  { %227 = vst [vmem:[#allocation7 + $0x8] sm:$0xff] %v166_v38  ;;  %235 = vst [vmem:[#allocation7 + $0x48] sm:$0xff] %v198_v39 }
 0x106   :  { %v306_v40 = vpop.f32.mrf.mxu0  ;;  %v314_v41 = vpop.f32.mrf.mxu1 }
 0x107   :  { %232 = vst [vmem:[#allocation7 + $0x30] sm:$0xff] %v306_v40  ;;  %240 = vst [vmem:[#allocation7 + $0x70] sm:$0xff] %v314_v41 }
 0x108   :  { %v179_v42 = vpop.f32.mrf.mxu0  ;;  %v211_v43 = vpop.f32.mrf.mxu1 }
 0x109   :  { %230 = vst [vmem:[#allocation7 + $0x20] sm:$0xff] %v179_v42  ;;  %238 = vst [vmem:[#allocation7 + $0x60] sm:$0xff] %v211_v43 }
 0x10a   :  { %v307_v44 = vpop.f32.mrf.mxu0  ;;  %v315_v45 = vpop.f32.mrf.mxu1 }
 0x10b   :  { %233 = vst [vmem:[#allocation7 + $0x38] sm:$0xff] %v307_v44  ;;  %241 = vst [vmem:[#allocation7 + $0x78] sm:$0xff] %v315_v45 }
 0x10c   :  { %v182_v46 = vpop.f32.mrf.mxu0  ;;  %v214_v47 = vpop.f32.mrf.mxu1 }
 0x10d   :  { %231 = vst [vmem:[#allocation7 + $0x28] sm:$0xff] %v182_v46  ;;  %239 = vst [vmem:[#allocation7 + $0x68] sm:$0xff] %v214_v47 }
 0x10e   :  { %398 = shalt.err (!%p395_p0)
}
 0x10f   :  { %253 = dma.vmem_to_hbm [thread:$0]  %s248_s1, 2048, %s452_s2, [#allocation4], %s414_s12, %s414_s12, %s415_s13  }
 0x110   :  { %411 = dma.done.wait [#allocation4], 2048  }
 0x111   :  { %412 = vsyncadd [#allocation4], 4294965248 }
 0x112   :  { %257 = vsyncpa [#allocation3], 1 }
 0x113   :  { %258 = vsyncpa [#allocation6], 1 }
 0x114   :  { %259 = vsyncpa [#allocation4], 1 }

</bundles_post_ra>
